<compile_context>
chip_gen: v5e
topology: v5e:2x2
jax: 0.10.0
libtpu: 0.0.40
codegen_flags: <defaults>
</compile_context>

<pallas_src>
import math

import jax
import jax.numpy as jnp
from jax.experimental import pallas as pl
from jax.experimental.pallas import tpu as pltpu


def _round_up(n: int, m: int) -> int:
    return ((n + m - 1) // m) * m


def _cdiv(a: int, b: int) -> int:
    return -(-a // b)


# ----------------------------------------------------------------------------
# One-time capability / hardware probes (cached at module level)
# ----------------------------------------------------------------------------
_BUFFERED1_OK = None


def _supports_single_buffered_params() -> bool:
    """Cached one-time probe: does this jax/Mosaic accept pipeline_mode=
    pl.Buffered(1) for grid-invariant operands?  Compiles one trivial kernel;
    the real forward path never retries or compiles twice."""
    global _BUFFERED1_OK
    if _BUFFERED1_OK is not None:
        return _BUFFERED1_OK
    try:
        spec = pl.BlockSpec((8, 128), lambda i: (0, 0),
                            pipeline_mode=pl.Buffered(buffer_count=1))

        def _probe(w_ref, o_ref):
            o_ref[...] = w_ref[...] + 1.0

        fn = pl.pallas_call(
            _probe,
            out_shape=jax.ShapeDtypeStruct((8, 128), jnp.float32),
            grid_spec=pltpu.PrefetchScalarGridSpec(
                num_scalar_prefetch=0, grid=(1,),
                in_specs=[spec],
                out_specs=pl.BlockSpec((8, 128), lambda i: (0, 0))),
        )
        jax.block_until_ready(fn(jnp.zeros((8, 128), jnp.float32)))
        _BUFFERED1_OK = True
    except Exception:
        # Probe kernel is trivial: any failure simply means "feature unsupported";
        # real-model failures are NOT masked here (forward compiles exactly once).
        _BUFFERED1_OK = False
    return _BUFFERED1_OK


def _vmem_budget_bytes() -> int:
    """Usable VMEM per TensorCore, generation-aware: capacity minus ~16 MiB of
    headroom for Mosaic internal scratch / pipeline buffers (~48 MiB on v7x,
    ~112 MiB on v5e/v6e)."""
    try:
        cap = int(pltpu.get_tpu_info().vmem_capacity_bytes)
    except Exception:
        cap = 64 << 20
    return max(cap - (16 << 20), 16 << 20)


# ----------------------------------------------------------------------------
# Kernel
# ----------------------------------------------------------------------------
def _make_mlp_kernel(num_hidden_layers: int, dims_pad, activation: str):
    """Fused MLP kernel.  Ref order: (x, W_0..W_L, packed_biases, out).
    Weights are [D_in_pad, D_out_pad]; packed_biases is [8k, max_dout_pad] with
    row i holding the (zero-padded) bias of layer i."""
    use_relu = activation.lower() == "relu"

    def kernel(*refs):
        x_ref = refs[0]
        w_refs = refs[1:1 + num_hidden_layers + 1]
        b_ref = refs[1 + num_hidden_layers + 1]
        out_ref = refs[-1]
        compute_dtype = x_ref.dtype

        biases = b_ref[...]                       # tiny, loaded once per step
        a = x_ref[...]
        for i in range(num_hidden_layers):
            do = dims_pad[i + 1]
            h = jnp.dot(a, w_refs[i][...], preferred_element_type=jnp.float32)
            h = h + biases[i:i + 1, :do].astype(jnp.float32)
            h = jnp.maximum(h, 0.0) if use_relu else jnp.tanh(h)   # VPU / EUP
            a = h.astype(compute_dtype)           # bf16 inter-layer act -> MXU

        L = num_hidden_layers
        logits = jnp.dot(a, w_refs[L][...], preferred_element_type=jnp.float32)
        logits = logits + biases[L:L + 1, :dims_pad[-1]].astype(jnp.float32)
        out_ref[...] = logits.astype(out_ref.dtype)

    return kernel


# ----------------------------------------------------------------------------
# One-time parameter preparation (hoisted out of the per-call forward)
# ----------------------------------------------------------------------------
def prepare_mf_mlp_params(params, num_classes, compute_dtype=jnp.bfloat16):
    """ONE-TIME prep (call once, reuse for every forward):
      * cast weights/biases to the compute dtype (bf16 default -> bf16 MXU path),
      * zero-pad every feature dim to a multiple of 128 (lane-dense, unmasked stores),
      * pack the L+1 biases into a single [8k, max_dout_pad] operand.
    `params` is the flat list [W1, b1, ..., WL, bL, W_out, b_out] with W_i already
    transposed to [D_in, D_out] and b_i of shape [1, D_out]."""
    num_hidden_layers = (len(params) - 2) // 2
    dims = [int(params[0].shape[0])]
    for i in range(num_hidden_layers):
        dims.append(int(params[2 * i].shape[1]))
    dims.append(int(num_classes))
    dims_pad = [_round_up(d, 128) for d in dims]

    weights = []
    for i in range(num_hidden_layers + 1):
        w = params[2 * i].astype(compute_dtype)
        di, do = dims_pad[i], dims_pad[i + 1]
        weights.append(jnp.pad(w, ((0, di - w.shape[0]), (0, do - w.shape[1]))))

    max_dout = max(dims_pad[1:])
    n_rows = _round_up(num_hidden_layers + 1, 8)       # sublane-aligned pack
    rows = []
    for i in range(num_hidden_layers + 1):
        b = params[2 * i + 1].reshape(1, -1).astype(compute_dtype)
        rows.append(jnp.pad(b, ((0, 0), (0, max_dout - b.shape[1]))))
    rows.append(jnp.zeros((n_rows - (num_hidden_layers + 1), max_dout), compute_dtype))
    biases = jnp.concatenate(rows, axis=0)

    itemsize = jnp.dtype(compute_dtype).itemsize
    param_bytes = (sum(int(w.size) for w in weights) + int(biases.size)) * itemsize

    return dict(
        weights=tuple(weights),
        biases=biases,
        dims=tuple(dims),
        dims_pad=tuple(dims_pad),
        num_hidden_layers=num_hidden_layers,
        num_classes=int(num_classes),
        compute_dtype=jnp.dtype(compute_dtype),
        param_bytes=int(param_bytes),
    )


def _choose_batch_tile(B: int, row_align: int, max_rows: int) -> int:
    """Rows per grid step: <= max_rows (VMEM-driven), row_align-aligned,
    256-aligned when large (fills the 2x256^2 MXU on v6e/v7x), and split into
    >=2 steps when the whole batch would fit in one so v7x megacore can use
    both TensorCores."""
    B_al = _round_up(max(B, 1), row_align)
    tb = min(max(max_rows, row_align), B_al)
    if tb >= B_al:
        half = _cdiv(B_al, 2)
        if half >= 256:              # split only when each half still fills the MXU
            tb = _round_up(half, row_align)
        else:
            tb = B_al
    elif tb >= 256:
        tb = (tb // 256) * 256
    return max(row_align, (tb // row_align) * row_align)


# ----------------------------------------------------------------------------
# Forward wrapper (no host sync, no double-compile, jit-friendly)
# ----------------------------------------------------------------------------
def mf_mlp_forward(x, prepared, *, activation: str = "relu",
                   batch_tile: int | None = None, out_dtype=None):
    """Fused MF_MLP forward via a single pallas_call.
    `prepared` comes from prepare_mf_mlp_params (one-time)."""
    B, d_in = x.shape
    dims = prepared["dims"]
    dims_pad = prepared["dims_pad"]
    L = prepared["num_hidden_layers"]
    num_classes = prepared["num_classes"]
    compute_dtype = prepared["compute_dtype"]
    weights = prepared["weights"]
    biases = prepared["biases"]
    param_bytes = prepared["param_bytes"]
    assert d_in == dims[0], f"input dim {d_in} != prepared {dims[0]}"

    out_dtype = jnp.dtype(out_dtype) if out_dtype is not None else x.dtype
    itemsize = jnp.dtype(compute_dtype).itemsize
    out_itemsize = jnp.dtype(out_dtype).itemsize
    d_in_pad, out_pad, d_max = dims_pad[0], dims_pad[-1], max(dims_pad)
    row_align = max(8, 32 // itemsize)            # 8 rows for f32, 16 for bf16

    single_buffer = _supports_single_buffered_params()
    param_bufs = 1 if single_buffer else 2

    # ---- generation-aware VMEM budget and batch-tile choice -----------------
    budget = _vmem_budget_bytes()
    # bytes/row resident: double-buffered x & out streams + live f32 h + compute-dtype a
    per_row = 2 * (d_in_pad * itemsize + out_pad * out_itemsize) \
        + d_max * (4 + itemsize)
    avail = budget - param_bufs * param_bytes - (4 << 20)
    max_rows = int(min(1024, max(avail // max(per_row, 1), row_align)))
    tb = batch_tile if batch_tile is not None else _choose_batch_tile(B, row_align, max_rows)
    tb = max(row_align, _round_up(tb, row_align))
    B_pad = _round_up(B, tb)
    grid = B_pad // tb

    # ---- cast/pad x only if actually needed ---------------------------------
    if x.dtype != compute_dtype:
        x = x.astype(compute_dtype)
    if B_pad != B or d_in_pad != d_in:
        x = jnp.pad(x, ((0, B_pad - B), (0, d_in_pad - d_in)))

    kernel = _make_mlp_kernel(L, dims_pad, activation)

    # ---- cost estimate (helps XLA scheduling around the custom call) --------
    flops = 2 * B_pad * sum(dims_pad[i] * dims_pad[i + 1]
                            for i in range(len(dims_pad) - 1))
    transcendentals = 0 if activation.lower() == "relu" else B_pad * sum(dims_pad[1:-1])
    bytes_accessed = (B_pad * d_in_pad * itemsize + param_bytes
                      + B_pad * out_pad * out_itemsize)
    cost = pl.CostEstimate(flops=int(flops), transcendentals=int(transcendentals),
                           bytes_accessed=int(bytes_accessed))

    # ---- VMEM request: actual need, clamped to the per-generation budget ----
    vmem_need = (param_bufs * param_bytes
                 + 2 * tb * (d_in_pad * itemsize + out_pad * out_itemsize)
                 + tb * d_max * (4 + itemsize)
                 + (4 << 20))
    # TODO(synk): if vmem_need > budget (very wide hidden layers), tile the widest
    # layer's output-feature dim or split the output Linear into its own pallas_call.
    vmem_limit = int(min(max(vmem_need, 16 << 20), budget))

    param_kwargs = {}
    if single_buffer:
        # Grid-invariant operands: double-buffering them is pure VMEM waste.
        param_kwargs = dict(pipeline_mode=pl.Buffered(buffer_count=1))

    in_specs = [pl.BlockSpec((tb, d_in_pad), lambda i: (i, 0))]
    for w in weights:
        in_specs.append(pl.BlockSpec(w.shape, lambda i: (0, 0), **param_kwargs))
    in_specs.append(pl.BlockSpec(biases.shape, lambda i: (0, 0), **param_kwargs))

    out_p = pl.pallas_call(
        kernel,
        out_shape=jax.ShapeDtypeStruct((B_pad, out_pad), out_dtype),
        grid_spec=pltpu.PrefetchScalarGridSpec(
            num_scalar_prefetch=0,
            grid=(grid,),
            in_specs=in_specs,
            out_specs=pl.BlockSpec((tb, out_pad), lambda i: (i, 0)),
        ),
        compiler_params=pltpu.CompilerParams(
            dimension_semantics=("parallel",),   # batch axis shards across v7x TCs
            vmem_limit_bytes=vmem_limit,
        ),
        cost_estimate=cost,
    )(x, *weights, biases)

    return out_p[:B, :num_classes]


# ----------------------------------------------------------------------------
# Deterministic parameter init (mirrors MF_MLP.__init__ shapes)
# ----------------------------------------------------------------------------
def init_mf_mlp_params(key, input_dim, hidden_dims, num_classes,
                       activation="relu", dtype=jnp.float32):
    """Returns (flat_param_list, projection_matrices); weights already
    transposed to [D_in, D_out]; biases zero; output weight ~ N(0, 0.01)."""
    params = []
    current_dim = input_dim
    for h_dim in hidden_dims:
        key, sub = jax.random.split(key)
        fan_in = current_dim
        if activation.lower() == "relu":
            bound = math.sqrt(2.0) * math.sqrt(3.0 / fan_in)
        else:
            bound = math.sqrt(6.0 / (fan_in + h_dim))
        w = jax.random.uniform(sub, (current_dim, h_dim), jnp.float32,
                               minval=-bound, maxval=bound).astype(dtype)
        b = jnp.zeros((1, h_dim), dtype)
        params += [w, b]
        current_dim = h_dim

    key, sub = jax.random.split(key)
    w_out = (0.01 * jax.random.normal(sub, (current_dim, num_classes),
                                      jnp.float32)).astype(dtype)
    b_out = jnp.zeros((1, num_classes), dtype)
    params += [w_out, b_out]

    # TODO(synk): projection matrices M_0..M_L belong to the MF local-loss
    # algorithm, not forward(); initialized for shape completeness only.
    projection_matrices = []
    for layer_dim in [input_dim] + list(hidden_dims):
        key, sub = jax.random.split(key)
        bound = math.sqrt(1.0 / layer_dim)
        projection_matrices.append(
            jax.random.uniform(sub, (num_classes, layer_dim), jnp.float32,
                               minval=-bound, maxval=bound))
    return params, projection_matrices


# ----------------------------------------------------------------------------
# Pure-JAX reference for correctness check
# ----------------------------------------------------------------------------
def mf_mlp_reference(x, params, activation="relu"):
    num_hidden_layers = (len(params) - 2) // 2
    a = x.astype(jnp.float32)
    for i in range(num_hidden_layers):
        a = a @ params[2 * i].astype(jnp.float32) + params[2 * i + 1].astype(jnp.float32)
        a = jnp.maximum(a, 0.0) if activation == "relu" else jnp.tanh(a)
    return a @ params[-2].astype(jnp.float32) + params[-1].astype(jnp.float32)


if __name__ == "__main__":
    # Small shapes consistent with the module: flattened input -> hidden -> classes.
    batch = 8
    input_dim = 32
    hidden_dims = [64, 32]
    num_classes = 16
    activation = "relu"

    key = jax.random.PRNGKey(0)
    key, xk = jax.random.split(key)
    x = jax.random.normal(xk, (batch, input_dim), jnp.float32)

    params, _proj_mats = init_mf_mlp_params(
        key, input_dim, hidden_dims, num_classes, activation, dtype=jnp.float32)
    ref = mf_mlp_reference(x, params, activation)

    # f32 compute path: tight tolerance vs. reference.
    prep_f32 = prepare_mf_mlp_params(params, num_classes, compute_dtype=jnp.float32)
    y_f32 = jax.block_until_ready(mf_mlp_forward(x, prep_f32, activation=activation))
    assert y_f32.shape == (batch, num_classes)
    assert jnp.allclose(y_f32, ref, atol=1e-4, rtol=1e-4), "f32 mismatch vs reference"

    # Default bf16 compute path (fast path on all generations): looser tolerance.
    prep_bf16 = prepare_mf_mlp_params(params, num_classes)   # bf16 default
    y_bf16 = jax.block_until_ready(mf_mlp_forward(x, prep_bf16, activation=activation))
    assert y_bf16.shape == (batch, num_classes)
    assert jnp.allclose(y_bf16.astype(jnp.float32), ref, atol=5e-2, rtol=5e-2), \
        "bf16 mismatch vs reference"

    print("KERNEL_OK")
</pallas_src>

<mosaic_0001>
module attributes {stable_mosaic.version = 11 : i64} {
  func.func @_probe(%arg0: i32, %arg1: memref<8x128xf32, #tpu.memory_space<vmem>>, %arg2: memref<8x128xf32, #tpu.memory_space<vmem>>) attributes {dimension_semantics = [#tpu.dimension_semantics<arbitrary>], iteration_bounds = array<i64: 1>, scalar_prefetch = 0 : i64, scratch_operands = 0 : i64, tpu.core_type = #tpu.core_type<tc>, window_params = [{pipeline_mode = #tpu.pipeline_mode<synchronous>, transform_indices = @transform_0, window_bounds = array<i64: 8, 128>}, {pipeline_mode = #tpu.pipeline_mode<synchronous>, transform_indices = @transform_1, window_bounds = array<i64: 8, 128>}]} {
    %c0 = arith.constant 0 : index
    %c0_0 = arith.constant 0 : index
    %0 = vector.load %arg1[%c0, %c0_0] : memref<8x128xf32, #tpu.memory_space<vmem>>, vector<8x128xf32>
    %cst = arith.constant 1.000000e+00 : f32
    %1 = vector.broadcast %cst : f32 to vector<8x128xf32>
    %2 = arith.addf %0, %1 : vector<8x128xf32>
    %c0_1 = arith.constant 0 : index
    %c0_2 = arith.constant 0 : index
    %3 = vector.load %arg2[%c0_1, %c0_2] : memref<8x128xf32, #tpu.memory_space<vmem>>, vector<8x128xf32>
    tpu.vector_store %arg2[%c0_1, %c0_2], %2 {strides = array<i32>} : memref<8x128xf32, #tpu.memory_space<vmem>>, vector<8x128xf32>,
    return
  }
  func.func @transform_0(%arg0: i32) -> (i32, i32) {
    %c0_i32 = arith.constant 0 : i32
    %c0_i32_0 = arith.constant 0 : i32
    %c0_i32_1 = arith.constant 0 : i32
    return %c0_i32, %c0_i32_0 : i32, i32
  }
  func.func @transform_1(%arg0: i32) -> (i32, i32) {
    %c0_i32 = arith.constant 0 : i32
    %c0_i32_0 = arith.constant 0 : i32
    %c0_i32_1 = arith.constant 0 : i32
    return %c0_i32, %c0_i32_0 : i32, i32
  }
}

module attributes {stable_mosaic.version = 11 : i64} {
  func.func @kernel(%arg0: i32, %arg1: memref<8x128xf32, #tpu.memory_space<vmem>>, %arg2: memref<128x128xf32, #tpu.memory_space<vmem>>, %arg3: memref<128x128xf32, #tpu.memory_space<vmem>>, %arg4: memref<128x128xf32, #tpu.memory_space<vmem>>, %arg5: memref<8x128xf32, #tpu.memory_space<vmem>>, %arg6: memref<8x128xf32, #tpu.memory_space<vmem>>) attributes {dimension_semantics = [#tpu.dimension_semantics<parallel>], iteration_bounds = array<i64: 1>, scalar_prefetch = 0 : i64, scratch_operands = 0 : i64, tpu.core_type = #tpu.core_type<tc>, window_params = [{transform_indices = @transform_0, window_bounds = array<i64: 8, 128>}, {pipeline_mode = #tpu.pipeline_mode<synchronous>, transform_indices = @transform_1, window_bounds = array<i64: 128, 128>}, {pipeline_mode = #tpu.pipeline_mode<synchronous>, transform_indices = @transform_2, window_bounds = array<i64: 128, 128>}, {pipeline_mode = #tpu.pipeline_mode<synchronous>, transform_indices = @transform_3, window_bounds = array<i64: 128, 128>}, {pipeline_mode = #tpu.pipeline_mode<synchronous>, transform_indices = @transform_4, window_bounds = array<i64: 8, 128>}, {transform_indices = @transform_5, window_bounds = array<i64: 8, 128>}]} {
    %c0 = arith.constant 0 : index
    %c0_0 = arith.constant 0 : index
    %0 = vector.load %arg5[%c0, %c0_0] : memref<8x128xf32, #tpu.memory_space<vmem>>, vector<8x128xf32>
    %c0_1 = arith.constant 0 : index
    %c0_2 = arith.constant 0 : index
    %1 = vector.load %arg1[%c0_1, %c0_2] : memref<8x128xf32, #tpu.memory_space<vmem>>, vector<8x128xf32>
    %c0_3 = arith.constant 0 : index
    %c0_4 = arith.constant 0 : index
    %2 = vector.load %arg2[%c0_3, %c0_4] : memref<128x128xf32, #tpu.memory_space<vmem>>, vector<128x128xf32>
    %cst = arith.constant dense<0.000000e+00> : vector<8x128xf32>
    %3 = tpu.matmul %1, %2, %cst {dimension_numbers = #tpu.dot_dimension_numbers<[1], [0], [0], [1], [0, 0, 1, 1], [], []>} : vector<8x128xf32>, vector<128x128xf32>, vector<8x128xf32> -> vector<8x128xf32>
    %4 = vector.extract_strided_slice %0 {offsets = [0, 0], sizes = [1, 128], strides = [1, 1]} : vector<8x128xf32> to vector<1x128xf32>
    %5 = vector.broadcast %4 : vector<1x128xf32> to vector<8x128xf32>
    %6 = arith.addf %3, %5 : vector<8x128xf32>
    %cst_5 = arith.constant 0.000000e+00 : f32
    %7 = vector.broadcast %cst_5 : f32 to vector<8x128xf32>
    %8 = arith.maximumf %6, %7 : vector<8x128xf32>
    %c0_6 = arith.constant 0 : index
    %c0_7 = arith.constant 0 : index
    %9 = vector.load %arg3[%c0_6, %c0_7] : memref<128x128xf32, #tpu.memory_space<vmem>>, vector<128x128xf32>
    %cst_8 = arith.constant dense<0.000000e+00> : vector<8x128xf32>
    %10 = tpu.matmul %8, %9, %cst_8 {dimension_numbers = #tpu.dot_dimension_numbers<[1], [0], [0], [1], [0, 0, 1, 1], [], []>} : vector<8x128xf32>, vector<128x128xf32>, vector<8x128xf32> -> vector<8x128xf32>
    %11 = vector.extract_strided_slice %0 {offsets = [1, 0], sizes = [1, 128], strides = [1, 1]} : vector<8x128xf32> to vector<1x128xf32>
    %12 = vector.broadcast %11 : vector<1x128xf32> to vector<8x128xf32>
    %13 = arith.addf %10, %12 : vector<8x128xf32>
    %cst_9 = arith.constant 0.000000e+00 : f32
    %14 = vector.broadcast %cst_9 : f32 to vector<8x128xf32>
    %15 = arith.maximumf %13, %14 : vector<8x128xf32>
    %c0_10 = arith.constant 0 : index
    %c0_11 = arith.constant 0 : index
    %16 = vector.load %arg4[%c0_10, %c0_11] : memref<128x128xf32, #tpu.memory_space<vmem>>, vector<128x128xf32>
    %cst_12 = arith.constant dense<0.000000e+00> : vector<8x128xf32>
    %17 = tpu.matmul %15, %16, %cst_12 {dimension_numbers = #tpu.dot_dimension_numbers<[1], [0], [0], [1], [0, 0, 1, 1], [], []>} : vector<8x128xf32>, vector<128x128xf32>, vector<8x128xf32> -> vector<8x128xf32>
    %18 = vector.extract_strided_slice %0 {offsets = [2, 0], sizes = [1, 128], strides = [1, 1]} : vector<8x128xf32> to vector<1x128xf32>
    %19 = vector.broadcast %18 : vector<1x128xf32> to vector<8x128xf32>
    %20 = arith.addf %17, %19 : vector<8x128xf32>
    %c0_13 = arith.constant 0 : index
    %c0_14 = arith.constant 0 : index
    %21 = vector.load %arg6[%c0_13, %c0_14] : memref<8x128xf32, #tpu.memory_space<vmem>>, vector<8x128xf32>
    tpu.vector_store %arg6[%c0_13, %c0_14], %20 {strides = array<i32>} : memref<8x128xf32, #tpu.memory_space<vmem>>, vector<8x128xf32>,
    return
  }
  func.func @transform_0(%arg0: i32) -> (i32, i32) {
    %c0_i32 = arith.constant 0 : i32
    %c0_i32_0 = arith.constant 0 : i32
    return %arg0, %c0_i32 : i32, i32
  }
  func.func @transform_1(%arg0: i32) -> (i32, i32) {
    %c0_i32 = arith.constant 0 : i32
    %c0_i32_0 = arith.constant 0 : i32
    %c0_i32_1 = arith.constant 0 : i32
    return %c0_i32, %c0_i32_0 : i32, i32
  }
  func.func @transform_2(%arg0: i32) -> (i32, i32) {
    %c0_i32 = arith.constant 0 : i32
    %c0_i32_0 = arith.constant 0 : i32
    %c0_i32_1 = arith.constant 0 : i32
    return %c0_i32, %c0_i32_0 : i32, i32
  }
  func.func @transform_3(%arg0: i32) -> (i32, i32) {
    %c0_i32 = arith.constant 0 : i32
    %c0_i32_0 = arith.constant 0 : i32
    %c0_i32_1 = arith.constant 0 : i32
    return %c0_i32, %c0_i32_0 : i32, i32
  }
  func.func @transform_4(%arg0: i32) -> (i32, i32) {
    %c0_i32 = arith.constant 0 : i32
    %c0_i32_0 = arith.constant 0 : i32
    %c0_i32_1 = arith.constant 0 : i32
    return %c0_i32, %c0_i32_0 : i32, i32
  }
  func.func @transform_5(%arg0: i32) -> (i32, i32) {
    %c0_i32 = arith.constant 0 : i32
    %c0_i32_0 = arith.constant 0 : i32
    return %arg0, %c0_i32 : i32, i32
  }
}

</mosaic_0001>

<bundles_post_ra>
// kernel: tpu_custom_call.1
= control target key start
LH: loop header
LB: loop body
LE: loop exit
PB: predicated region body
PF: predicated region fallthrough
CT: control target
= control target key end

     0   :  { %6 = vsyncpa [#allocation3], 0  ;;  %s115_s0 = inlined_call_operand.hbm [shape: f32[8,128], index: 0, kind: input, shape index: {}]   ;;  %s116_s1 = inlined_call_operand.hbm [shape: f32[8,128], index: 1, kind: output, shape index: {}]  }
   0x1   :  { %7 = vsyncpa [#allocation4], 0  ;;  %s13_s8 = sshll.u32 %s115_s0, 4  ;;  %s97_s9 = smov [#allocation2]   ;;  %s14_s8 = int_to_ptr.hbm [resolvable:$true] %s13_s8 }
   0x2   :  { %s15_s10 = sshll.u32 %s97_s9, 4  ;;  %s16_s10 = int_to_ptr.vmem [resolvable:$true] %s15_s10 }
   0x3   :  { %18 = dma.hbm_to_vmem [thread:$0]  %s14_s8, 128, %s16_s10, [#allocation3]  }
   0x4   :  { %93 = dma.done.wait [#allocation3], 128  }
   0x5   :  { %94 = vsyncadd [#allocation3], 4294967168  ;;  %s98_s11 = smov [#allocation5]   ;;  %s33_s15 = sshll.u32 %s116_s1, 4  ;;  %v23_v0 = vld [vmem:[#allocation2] sm:$0xff]  ;;  %s34_s15 = int_to_ptr.hbm [resolvable:$true] %s33_s15 }
   0x6   :  { %s31_s12 = sshll.u32 %s98_s11, 4  ;;  %v24_v1 = vadd.f32 1.0, %v23_v0  ;;  %s32_s12 = int_to_ptr.vmem [resolvable:$true] %s31_s12 }
   0x8   :  { %25 = vst [vmem:[#allocation5] sm:$0xff] %v24_v1 }
   0x9   :  { %36 = dma.vmem_to_hbm [thread:$0]  %s32_s12, 128, %s34_s15, [#allocation4]  }
   0xa   :  { %95 = dma.done.wait [#allocation4], 128  }
   0xb   :  { %96 = vsyncadd [#allocation4], 4294967168 }
   0xc   :  { %41 = vsyncpa [#allocation3], 1 }
   0xd   :  { %42 = vsyncpa [#allocation4], 1 }

// kernel: tpu_custom_call.1
= control target key start
LH: loop header
LB: loop body
LE: loop exit
PB: predicated region body
PF: predicated region fallthrough
CT: control target
= control target key end

     0   :  { %10 = vsyncpa [#allocation3], 0  ;;  %s446_s0 = inlined_call_operand.hbm [shape: f32[8,128], index: 0, kind: input, shape index: {}]   ;;  %s447_s1 = inlined_call_operand.hbm [shape: f32[128,128], index: 1, kind: input, shape index: {}]   ;;  %s448_s2 = inlined_call_operand.hbm [shape: f32[128,128], index: 2, kind: input, shape index: {}]   ;;  %s449_s3 = inlined_call_operand.hbm [shape: f32[128,128], index: 3, kind: input, shape index: {}]   ;;  %s450_s4 = inlined_call_operand.hbm [shape: f32[8,128], index: 4, kind: input, shape index: {}]   ;;  %s451_s5 = inlined_call_operand.hbm [shape: f32[8,128], index: 5, kind: output, shape index: {}]  }
   0x1   :  { %11 = vsyncpa [#allocation6], 0 }
   0x2   :  { %12 = vsyncpa [#allocation9], 0  ;;  %s29_s20 = sshll.u32 %s447_s1, 4  ;;  %s30_s20 = int_to_ptr.hbm [resolvable:$true] %s29_s20 }
   0x3   :  { %13 = vsyncpa [#allocation4], 0  ;;  %s390_s21 = smov [#allocation5]   ;;  %s55_s25 = sshll.u32 %s449_s3, 4  ;;  %s56_s25 = int_to_ptr.hbm [resolvable:$true] %s55_s25 }
   0x4   :  { %s31_s22 = sshll.u32 %s390_s21, 4  ;;  %s391_s26 = smov 128   ;;  %s32_s22 = int_to_ptr.vmem [resolvable:$true] %s31_s22 }
   0x5   :  { %s392_s27 = smov 8   ;;  %s393_s28 = smov [#allocation8]  }
   0x6   :  { %37 = dma.hbm_to_vmem [thread:$0]  %s30_s20, 2048, %s32_s22, [#allocation6], %s391_s26, %s391_s26, %s392_s27  }
   0x7   :  { %s57_s29 = sshll.u32 %s393_s28, 4  ;;  %s19_s7 = sshll.u32 %s446_s0, 4  ;;  %s58_s29 = int_to_ptr.vmem [resolvable:$true] %s57_s29  ;;  %s20_s7 = int_to_ptr.hbm [resolvable:$true] %s19_s7 }
   0x8   :  { %63 = dma.hbm_to_vmem [thread:$0]  %s56_s25, 2048, %s58_s29, [#allocation9], %s391_s26, %s391_s26, %s392_s27  }
   0x9   :  { %s42_s9 = sshll.u32 %s448_s2, 4  ;;  %s394_s10 = smov [#allocation2]   ;;  %s43_s9 = int_to_ptr.hbm [resolvable:$true] %s42_s9 }
   0xa   :  { %s21_s11 = sshll.u32 %s394_s10, 4  ;;  %s395_s3 = smov [#allocation7]   ;;  %s22_s11 = int_to_ptr.vmem [resolvable:$true] %s21_s11 }
   0xb   :  { %24 = dma.hbm_to_vmem [thread:$0]  %s20_s7, 128, %s22_s11, [#allocation3]  }
   0xc   :  { %s44_s12 = sshll.u32 %s395_s3, 4  ;;  %s69_s15 = sshll.u32 %s450_s4, 4  ;;  %s45_s12 = int_to_ptr.vmem [resolvable:$true] %s44_s12  ;;  %s70_s15 = int_to_ptr.hbm [resolvable:$true] %s69_s15 }
   0xd   :  { %50 = dma.hbm_to_vmem [thread:$0]  %s43_s9, 2048, %s45_s12, [#allocation6], %s391_s26, %s391_s26, %s392_s27  }
   0xe   :  { %s396_s0 = smov [#allocation10]  }
   0xf   :  { %s71_s16 = sshll.u32 %s396_s0, 4  ;;  %s72_s16 = int_to_ptr.vmem [resolvable:$true] %s71_s16 }
  0x10   :  { %74 = dma.hbm_to_vmem [thread:$0]  %s70_s15, 128, %s72_s16, [#allocation9]  }
  0x11   :  { %382 = dma.done.wait [#allocation3], 128  }
  0x12   :  { %383 = vsyncadd [#allocation3], 4294967168 }
  0x13   :  { %384 = dma.done.wait [#allocation6], 4096  }
  0x14   :  { %385 = vsyncadd [#allocation6], 4294963200 }
  0x15   :  { %386 = dma.done.wait [#allocation9], 2176  }
  0x16   :  { %387 = vsyncadd [#allocation9], 4294965120  ;;  %v112_v0 = vld [vmem:[#allocation5 + $0x78] sm:$0xff]  ;;  %v111_v1 = vld [vmem:[#allocation5 + $0x70] sm:$0xff]  ;;  %s397_s2 = smov [#allocation11]   ;;  %s218_s19 = sshll.u32 %s451_s5, 4  ;;  %s219_s19 = int_to_ptr.hbm [resolvable:$true] %s218_s19 }
  0x17   :  { %114 = vmatpush.msra.mxu0 %v112_v0  ;;  %v110_v2 = vld [vmem:[#allocation5 + $0x68] sm:$0xff]  ;;  %v109_v3 = vld [vmem:[#allocation5 + $0x60] sm:$0xff]  ;;  %v150_v4 = vld [vmem:[#allocation7 + $0x78] sm:$0xff]  ;;  %s216_s4 = sshll.u32 %s397_s2, 4  ;;  %s217_s4 = int_to_ptr.vmem [resolvable:$true] %s216_s4 }
  0x18   :  { %v108_v5 = vld [vmem:[#allocation5 + $0x58] sm:$0xff]  ;;  %152 = vmatpush.msra.mxu1 %v150_v4  ;;  %v149_v6 = vld [vmem:[#allocation7 + $0x70] sm:$0xff]  ;;  %v148_v7 = vld [vmem:[#allocation7 + $0x68] sm:$0xff] }
  0x19   :  { %115 = vmatpush.msra.mxu0 %v111_v1  ;;  %v107_v8 = vld [vmem:[#allocation5 + $0x50] sm:$0xff]  ;;  %v147_v9 = vld [vmem:[#allocation7 + $0x60] sm:$0xff]  ;;  %v106_v10 = vld [vmem:[#allocation5 + $0x48] sm:$0xff] }
  0x1a   :  { %153 = vmatpush.msra.mxu1 %v149_v6  ;;  %v146_v11 = vld [vmem:[#allocation7 + $0x58] sm:$0xff]  ;;  %v105_v12 = vld [vmem:[#allocation5 + $0x40] sm:$0xff]  ;;  %v145_v13 = vld [vmem:[#allocation7 + $0x50] sm:$0xff] }
  0x1b   :  { %116 = vmatpush.msra.mxu0 %v110_v2  ;;  %v104_v14 = vld [vmem:[#allocation5 + $0x38] sm:$0xff]  ;;  %v144_v15 = vld [vmem:[#allocation7 + $0x48] sm:$0xff]  ;;  %v103_v16 = vld [vmem:[#allocation5 + $0x30] sm:$0xff] }
  0x1c   :  { %154 = vmatpush.msra.mxu1 %v148_v7  ;;  %v143_v17 = vld [vmem:[#allocation7 + $0x40] sm:$0xff]  ;;  %v102_v18 = vld [vmem:[#allocation5 + $0x28] sm:$0xff]  ;;  %v142_v19 = vld [vmem:[#allocation7 + $0x38] sm:$0xff] }
  0x1d   :  { %117 = vmatpush.msra.mxu0 %v109_v3  ;;  %v101_v20 = vld [vmem:[#allocation5 + $0x20] sm:$0xff]  ;;  %v141_v21 = vld [vmem:[#allocation7 + $0x30] sm:$0xff]  ;;  %v100_v22 = vld [vmem:[#allocation5 + $0x18] sm:$0xff] }
  0x1e   :  { %155 = vmatpush.msra.mxu1 %v147_v9  ;;  %v140_v23 = vld [vmem:[#allocation7 + $0x28] sm:$0xff]  ;;  %v99_v24 = vld [vmem:[#allocation5 + $0x10] sm:$0xff]  ;;  %v139_v25 = vld [vmem:[#allocation7 + $0x20] sm:$0xff] }
  0x1f   :  { %118 = vmatpush.msra.mxu0 %v108_v5  ;;  %v98_v26 = vld [vmem:[#allocation5 + $0x8] sm:$0xff]  ;;  %v138_v27 = vld [vmem:[#allocation7 + $0x18] sm:$0xff]  ;;  %v97_v28 = vld [vmem:[#allocation5] sm:$0xff] }
  0x20   :  { %156 = vmatpush.msra.mxu1 %v146_v11  ;;  %v96_v29 = vld [vmem:[#allocation2] sm:$0xff]  ;;  %v137_v30 = vld [vmem:[#allocation7 + $0x10] sm:$0xff]  ;;  %v136_v31 = vld [vmem:[#allocation7 + $0x8] sm:$0xff] }
  0x21   :  { %119 = vmatpush.msra.mxu0 %v107_v8  ;;  %v135_v32 = vld [vmem:[#allocation7] sm:$0xff]  ;;  %v188_v33 = vld [vmem:[#allocation8 + $0x78] sm:$0xff]  ;;  %v187_v34 = vld [vmem:[#allocation8 + $0x70] sm:$0xff] }
  0x22   :  { %157 = vmatpush.msra.mxu1 %v145_v13  ;;  %190 = vmatpush.msra.mxu2 %v188_v33  ;;  %v186_v35 = vld [vmem:[#allocation8 + $0x68] sm:$0xff]  ;;  %v185_v36 = vld [vmem:[#allocation8 + $0x60] sm:$0xff]  ;;  %v184_v37 = vld [vmem:[#allocation8 + $0x58] sm:$0xff] }
  0x23   :  { %120 = vmatpush.msra.mxu0 %v106_v10  ;;  %v183_v38 = vld [vmem:[#allocation8 + $0x50] sm:$0xff]  ;;  %v182_v39 = vld [vmem:[#allocation8 + $0x48] sm:$0xff]  ;;  %v181_v40 = vld [vmem:[#allocation8 + $0x40] sm:$0xff] }
  0x24   :  { %158 = vmatpush.msra.mxu1 %v144_v15  ;;  %191 = vmatpush.msra.mxu2 %v187_v34  ;;  %v180_v41 = vld [vmem:[#allocation8 + $0x38] sm:$0xff]  ;;  %v179_v42 = vld [vmem:[#allocation8 + $0x30] sm:$0xff]  ;;  %v178_v43 = vld [vmem:[#allocation8 + $0x28] sm:$0xff] }
  0x25   :  { %121 = vmatpush.msra.mxu0 %v105_v12  ;;  %v177_v44 = vld [vmem:[#allocation8 + $0x20] sm:$0xff]  ;;  %v176_v46 = vld [vmem:[#allocation8 + $0x18] sm:$0xff]  ;;  %v175_v51 = vld [vmem:[#allocation8 + $0x10] sm:$0xff] }
  0x26   :  { %159 = vmatpush.msra.mxu1 %v143_v17  ;;  %192 = vmatpush.msra.mxu2 %v186_v35  ;;  %v95_v45 = vld [vmem:[#allocation10] sm:$0xff]  ;;  %v174_v52 = vld [vmem:[#allocation8 + $0x8] sm:$0xff] }
  0x27   :  { %122 = vmatpush.msra.mxu0 %v104_v14  ;;  %v113_v47 = vperm.slane %v95_v45, 0  ;;  %v173_v53 = vld [vmem:[#allocation8] sm:$0xff]  ;;  %v151_v54 = vperm.slane %v95_v45, 1  ;;  %v189_v58 = vperm.slane %v95_v45, 2 }
  0x28   :  { %160 = vmatpush.msra.mxu1 %v142_v19  ;;  %193 = vmatpush.msra.mxu2 %v185_v36 }
  0x29   :  { %123 = vmatpush.msra.mxu0 %v103_v16 }
  0x2a   :  { %161 = vmatpush.msra.mxu1 %v141_v21  ;;  %194 = vmatpush.msra.mxu2 %v184_v37 }
  0x2b   :  { %124 = vmatpush.msra.mxu0 %v102_v18 }
  0x2c   :  { %162 = vmatpush.msra.mxu1 %v140_v23  ;;  %195 = vmatpush.msra.mxu2 %v183_v38 }
  0x2d   :  { %125 = vmatpush.msra.mxu0 %v101_v20 }
  0x2e   :  { %163 = vmatpush.msra.mxu1 %v139_v25  ;;  %196 = vmatpush.msra.mxu2 %v182_v39 }
  0x2f   :  { %126 = vmatpush.msra.mxu0 %v100_v22 }
  0x30   :  { %164 = vmatpush.msra.mxu1 %v138_v27  ;;  %197 = vmatpush.msra.mxu2 %v181_v40 }
  0x31   :  { %127 = vmatpush.msra.mxu0 %v99_v24 }
  0x32   :  { %165 = vmatpush.msra.mxu1 %v137_v30  ;;  %198 = vmatpush.msra.mxu2 %v180_v41 }
  0x33   :  { %128 = vmatpush.msra.mxu0 %v98_v26 }
  0x34   :  { %166 = vmatpush.msra.mxu1 %v136_v31  ;;  %199 = vmatpush.msra.mxu2 %v179_v42 }
  0x35   :  { %129 = vmatpush.msra.mxu0 %v97_v28 }
  0x36   :  { %130 = vmatmul.f32.vlgmr.msra.gmra.mxu0 %v96_v29  ;;  %167 = vmatpush.msra.mxu1 %v135_v32 }
  0x37   :  { %200 = vmatpush.msra.mxu2 %v178_v43 }
  0x39   :  { %201 = vmatpush.msra.mxu2 %v177_v44 }
  0x3b   :  { %202 = vmatpush.msra.mxu2 %v176_v46 }
  0x3d   :  { %203 = vmatpush.msra.mxu2 %v175_v51 }
  0x3f   :  { %204 = vmatpush.msra.mxu2 %v174_v52 }
  0x41   :  { %205 = vmatpush.msra.mxu2 %v173_v53 }
  0xb3   :  { %v131_v48 = vpop.f32.mrf.mxu0 }
  0xb4   :  { %v132_v49 = vadd.f32 %v131_v48, %v113_v47 }
  0xb6   :  { %v134_v50 = vmax.f32 %v132_v49, 0.0 }
  0xb8   :  { %168 = vmatmul.f32.vlgmr.msra.gmra.mxu1 %v134_v50 }
 0x135   :  { %v169_v55 = vpop.f32.mrf.mxu1 }
 0x136   :  { %v170_v56 = vadd.f32 %v169_v55, %v151_v54 }
 0x138   :  { %v172_v57 = vmax.f32 %v170_v56, 0.0 }
 0x13a   :  { %206 = vmatmul.f32.vlgmr.msra.gmra.mxu2 %v172_v57 }
 0x1bd   :  { %v207_v59 = vpop.f32.mrf.mxu2 }
 0x1be   :  { %v208_v60 = vadd.f32 %v207_v59, %v189_v58 }
 0x1c0   :  { %210 = vst [vmem:[#allocation11] sm:$0xff] %v208_v60 }
 0x1c1   :  { %221 = dma.vmem_to_hbm [thread:$0]  %s217_s4, 128, %s219_s19, [#allocation4]  }
 0x1c2   :  { %388 = dma.done.wait [#allocation4], 128  }
 0x1c3   :  { %389 = vsyncadd [#allocation4], 4294967168 }
 0x1c4   :  { %226 = vsyncpa [#allocation3], 1 }
 0x1c5   :  { %227 = vsyncpa [#allocation6], 1 }
 0x1c6   :  { %228 = vsyncpa [#allocation9], 1 }
 0x1c7   :  { %229 = vsyncpa [#allocation4], 1 }

</bundles_post_ra>
